<compile_context>
chip_gen: v5e
topology: v5e:2x2
jax: 0.10.0
libtpu: 0.0.40
codegen_flags: <defaults>
</compile_context>

<pallas_src>
import functools
import math

import jax
import jax.numpy as jnp
from jax.experimental import pallas as pl
from jax.experimental.pallas import tpu as pltpu


def skippable_kernel(x_ref, w_ref, o_ref, xpad_ref, *, W, LP):
    # x_ref    : (1, S, H*W)      packed slab, S = images_per_step * C sublanes
    # w_ref    : (S, 9*S + 1)     block-diag fused conv weights + bias column
    # o_ref    : (1, S, H*W)      output block (lane-dense, unmasked stores)
    # xpad_ref : (S, H*W + 2*LP)  VMEM scratch, zero-padded flat slab
    S = x_ref.shape[1]
    HW = x_ref.shape[2]

    x = x_ref[0].astype(jnp.float32)                         # (S, HW)

    # Zero-padded flat copy: out-of-image row taps then read zeros for free.
    xpad_ref[:, 0:LP] = jnp.zeros((S, LP), jnp.float32)
    xpad_ref[:, LP + HW:2 * LP + HW] = jnp.zeros((S, LP), jnp.float32)
    xpad_ref[:, LP:LP + HW] = x                              # aligned interior

    # Column-border masks (W borders), built once at full operand shape and
    # reused by the three left-shift / three right-shift taps.
    col = jax.lax.broadcasted_iota(jnp.int32, (S, HW), 1) % W
    can_left = col >= 1          # pixel (.., col-1) exists
    can_right = col <= W - 2     # pixel (.., col+1) exists

    # 9 shifted/masked taps + a ones row (bias), kept in registers.
    taps = []
    for kh in range(3):
        for kw in range(3):
            dh, dw = kh - 1, kw - 1
            off = dh * W + dw
            xs = xpad_ref[:, LP + off:LP + off + HW]         # (S, HW) window
            if dw == -1:
                xs = jnp.where(can_left, xs, 0.0)
            elif dw == 1:
                xs = jnp.where(can_right, xs, 0.0)
            taps.append(xs)
    taps.append(jnp.ones((1, HW), jnp.float32))              # bias "tap"
    patches = jnp.concatenate(taps, axis=0)                  # (9*S + 1, HW)

    # Single fused MXU contraction (K = 9*S + 1, bias folded in), then ReLU
    # and residual add — all full-tile VPU work, unmasked output stores.
    conv = jnp.dot(w_ref[...], patches, preferred_element_type=jnp.float32)
    o_ref[0] = (x + jnp.maximum(conv, 0.0)).astype(o_ref.dtype)


def _default_images_per_step(N, C):
    pack = max(1, min(N, 8 // max(C, 1)))    # images that fill 8 sublanes
    if pack <= 1 or pl.cdiv(N, pack) >= 2:
        return pack                          # >=2 steps anyway: fine everywhere
    # Packing collapses the batch into a single grid step: optimal on
    # single-TC v5e/v6e (fewest per-step overheads), but it would idle one of
    # v7x's two TensorCores — there, prefer one image per core instead.
    try:
        kind = jax.devices()[0].device_kind.lower()
    except Exception:
        kind = ""
    if ("v7" in kind or "7x" in kind) and N >= 2:
        return max(1, N // 2)
    return pack


def skippable_forward(x_nchw, w_oihw, b, images_per_step=None):
    """x_nchw: (N, C, H, W); w_oihw: (C, C, 3, 3) PyTorch OIHW; b: (C,)."""
    N, C, H, W = x_nchw.shape
    HW = H * W

    P = images_per_step if images_per_step is not None else \
        _default_images_per_step(N, C)
    n_steps = pl.cdiv(N, P)
    n_pad = n_steps * P
    S = P * C

    # Lane pad must cover the furthest out-of-image tap offset (W + 1).
    LP = max(128, pl.cdiv(W + 1, 128) * 128)
    assert LP >= W + 1

    # Wrapper-side glue is free / tiny: contiguous reshapes of the image and a
    # one-time reshuffle of the small weight tensor into fused form.
    x_flat = x_nchw.reshape(N, C, HW)
    if n_pad != N:
        x_flat = jnp.concatenate(
            [x_flat, jnp.zeros((n_pad - N, C, HW), x_flat.dtype)], axis=0)
    x_packed = x_flat.reshape(n_steps, S, HW)

    # Per-tap (co, ci) weights -> block-diagonal over the P packed images ->
    # fused (S, 9*S) matrix; bias appended as one extra K column.
    w_taps = jnp.transpose(w_oihw, (2, 3, 0, 1)).reshape(9, C, C)
    eye_p = jnp.eye(P, dtype=jnp.float32)
    w_bd = jnp.einsum("pq,tij->tpiqj", eye_p,
                      w_taps.astype(jnp.float32)).reshape(9, S, S)
    w_fused = jnp.transpose(w_bd, (1, 0, 2)).reshape(S, 9 * S)
    b_col = jnp.tile(b.astype(jnp.float32), P).reshape(S, 1)
    w_full = jnp.concatenate([w_fused, b_col], axis=1)       # (S, 9*S + 1)

    kernel = functools.partial(skippable_kernel, W=W, LP=LP)
    out_packed = pl.pallas_call(
        kernel,
        out_shape=jax.ShapeDtypeStruct((n_steps, S, HW), x_nchw.dtype),
        grid=(n_steps,),
        in_specs=[
            pl.BlockSpec((1, S, HW), lambda n: (n, 0, 0)),    # packed slab
            pl.BlockSpec((S, 9 * S + 1), lambda n: (0, 0)),   # fused W + bias
        ],
        out_specs=pl.BlockSpec((1, S, HW), lambda n: (n, 0, 0)),
        scratch_shapes=[
            pltpu.VMEM((S, HW + 2 * LP), jnp.float32),        # padded slab
        ],
        compiler_params=pltpu.CompilerParams(
            dimension_semantics=("parallel",)),
    )(x_packed, w_full)

    out = out_packed.reshape(n_pad, C, H, W)
    return out[:N] if n_pad != N else out


def _reference(x_nchw, w_oihw, b):
    conv = jax.lax.conv_general_dilated(
        x_nchw, w_oihw, window_strides=(1, 1), padding="SAME",
        dimension_numbers=("NCHW", "OIHW", "NCHW"))
    return x_nchw + jnp.maximum(conv + b[None, :, None, None], 0.0)


if __name__ == "__main__":
    key = jax.random.PRNGKey(0)
    k_x, k_w, k_b = jax.random.split(key, 3)

    N, C, H, W = 2, 4, 16, 16
    x = jax.random.normal(k_x, (N, C, H, W), dtype=jnp.float32)

    # Deterministic PyTorch-style Conv2d init: U(-1/sqrt(fan_in), 1/sqrt(fan_in))
    fan_in = C * 3 * 3
    bound = 1.0 / math.sqrt(fan_in)
    w = jax.random.uniform(k_w, (C, C, 3, 3), minval=-bound, maxval=bound,
                           dtype=jnp.float32)
    b = jax.random.uniform(k_b, (C,), minval=-bound, maxval=bound,
                           dtype=jnp.float32)

    out = skippable_forward(x, w, b)
    jax.block_until_ready(out)

    ref = _reference(x, w, b)
    assert out.shape == (N, C, H, W)
    assert jnp.allclose(out, ref, atol=1e-4, rtol=1e-4), "mismatch vs reference"
    print("KERNEL_OK")
</pallas_src>

<mosaic_0001>
module attributes {stable_mosaic.version = 11 : i64} {
  func.func @skippable_kernel(%arg0: i32, %arg1: memref<1x8x256xf32, #tpu.memory_space<vmem>>, %arg2: memref<8x73xf32, #tpu.memory_space<vmem>>, %arg3: memref<1x8x256xf32, #tpu.memory_space<vmem>>, %arg4: memref<8x512xf32, #tpu.memory_space<vmem>>) attributes {dimension_semantics = [#tpu.dimension_semantics<parallel>], iteration_bounds = array<i64: 1>, scalar_prefetch = 0 : i64, scratch_operands = 1 : i64, tpu.core_type = #tpu.core_type<tc>, window_params = [{transform_indices = @transform_0, window_bounds = array<i64: 1, 8, 256>}, {pipeline_mode = #tpu.pipeline_mode<synchronous>, transform_indices = @transform_1, window_bounds = array<i64: 8, 73>}, {transform_indices = @transform_2, window_bounds = array<i64: 1, 8, 256>}]} {
    %c0 = arith.constant 0 : index
    %c0_0 = arith.constant 0 : index
    %c0_1 = arith.constant 0 : index
    %0 = vector.load %arg1[%c0, %c0_0, %c0_1] : memref<1x8x256xf32, #tpu.memory_space<vmem>>, vector<1x8x256xf32>
    %1 = vector.shape_cast %0 : vector<1x8x256xf32> to vector<8x256xf32>
    %cst = arith.constant 0.000000e+00 : f32
    %2 = vector.broadcast %cst : f32 to vector<8x128xf32>
    %c0_2 = arith.constant 0 : index
    %c0_3 = arith.constant 0 : index
    %3 = vector.load %arg4[%c0_2, %c0_3] : memref<8x512xf32, #tpu.memory_space<vmem>>, vector<8x128xf32>
    tpu.vector_store %arg4[%c0_2, %c0_3], %2 {strides = array<i32>} : memref<8x512xf32, #tpu.memory_space<vmem>>, vector<8x128xf32>,
    %cst_4 = arith.constant 0.000000e+00 : f32
    %4 = vector.broadcast %cst_4 : f32 to vector<8x128xf32>
    %c0_5 = arith.constant 0 : index
    %c384 = arith.constant 384 : index
    %5 = vector.load %arg4[%c0_5, %c384] : memref<8x512xf32, #tpu.memory_space<vmem>>, vector<8x128xf32>
    tpu.vector_store %arg4[%c0_5, %c384], %4 {strides = array<i32>} : memref<8x512xf32, #tpu.memory_space<vmem>>, vector<8x128xf32>,
    %c0_6 = arith.constant 0 : index
    %c128 = arith.constant 128 : index
    %6 = vector.load %arg4[%c0_6, %c128] : memref<8x512xf32, #tpu.memory_space<vmem>>, vector<8x256xf32>
    tpu.vector_store %arg4[%c0_6, %c128], %1 {strides = array<i32>} : memref<8x512xf32, #tpu.memory_space<vmem>>, vector<8x256xf32>,
    %7 = tpu.iota {dimensions = array<i32: 1>} : vector<8x256xi32>
    %c16_i32 = arith.constant 16 : i32
    %c0_i32 = arith.constant 0 : i32
    %8 = arith.cmpi eq, %c16_i32, %c0_i32 : i32
    %c1_i32 = arith.constant 1 : i32
    %9 = arith.select %8, %c1_i32, %c16_i32 : i32
    %10 = vector.broadcast %9 : i32 to vector<8x256xi32>
    %11 = arith.remsi %7, %10 : vector<8x256xi32>
    %c0_i32_7 = arith.constant 0 : i32
    %12 = vector.broadcast %c0_i32_7 : i32 to vector<8x256xi32>
    %13 = arith.cmpi ne, %11, %12 : vector<8x256xi32>
    %c0_i32_8 = arith.constant 0 : i32
    %14 = vector.broadcast %c0_i32_8 : i32 to vector<8x256xi32>
    %15 = arith.cmpi slt, %11, %14 : vector<8x256xi32>
    %c0_i32_9 = arith.constant 0 : i32
    %16 = arith.cmpi slt, %9, %c0_i32_9 : i32
    %17 = vector.broadcast %16 : i1 to vector<8x256xi1>
    %18 = vector.broadcast %17 : vector<8x256xi1> to vector<8x256xi1>
    %19 = arith.xori %15, %18 : vector<8x256xi1>
    %20 = arith.andi %19, %13 : vector<8x256xi1>
    %21 = vector.broadcast %9 : i32 to vector<8x256xi32>
    %22 = arith.addi %11, %21 : vector<8x256xi32>
    %23 = arith.select %20, %22, %11 : vector<8x256xi1>, vector<8x256xi32>
    %c1_i32_10 = arith.constant 1 : i32
    %24 = vector.broadcast %c1_i32_10 : i32 to vector<8x256xi32>
    %25 = arith.cmpi sge, %23, %24 : vector<8x256xi32>
    %c14_i32 = arith.constant 14 : i32
    %26 = vector.broadcast %c14_i32 : i32 to vector<8x256xi32>
    %27 = arith.cmpi sle, %23, %26 : vector<8x256xi32>
    %c0_11 = arith.constant 0 : index
    %c111 = arith.constant 111 : index
    %28 = vector.load %arg4[%c0_11, %c111] : memref<8x512xf32, #tpu.memory_space<vmem>>, vector<8x256xf32>
    %cst_12 = arith.constant 0.000000e+00 : f32
    %29 = vector.broadcast %cst_12 : f32 to vector<8x256xf32>
    %30 = arith.select %25, %28, %29 : vector<8x256xi1>, vector<8x256xf32>
    %c0_13 = arith.constant 0 : index
    %c112 = arith.constant 112 : index
    %31 = vector.load %arg4[%c0_13, %c112] : memref<8x512xf32, #tpu.memory_space<vmem>>, vector<8x256xf32>
    %c0_14 = arith.constant 0 : index
    %c113 = arith.constant 113 : index
    %32 = vector.load %arg4[%c0_14, %c113] : memref<8x512xf32, #tpu.memory_space<vmem>>, vector<8x256xf32>
    %cst_15 = arith.constant 0.000000e+00 : f32
    %33 = vector.broadcast %cst_15 : f32 to vector<8x256xf32>
    %34 = arith.select %27, %32, %33 : vector<8x256xi1>, vector<8x256xf32>
    %c0_16 = arith.constant 0 : index
    %c127 = arith.constant 127 : index
    %35 = vector.load %arg4[%c0_16, %c127] : memref<8x512xf32, #tpu.memory_space<vmem>>, vector<8x256xf32>
    %cst_17 = arith.constant 0.000000e+00 : f32
    %36 = vector.broadcast %cst_17 : f32 to vector<8x256xf32>
    %37 = arith.select %25, %35, %36 : vector<8x256xi1>, vector<8x256xf32>
    %c0_18 = arith.constant 0 : index
    %c128_19 = arith.constant 128 : index
    %38 = vector.load %arg4[%c0_18, %c128_19] : memref<8x512xf32, #tpu.memory_space<vmem>>, vector<8x256xf32>
    %c0_20 = arith.constant 0 : index
    %c129 = arith.constant 129 : index
    %39 = vector.load %arg4[%c0_20, %c129] : memref<8x512xf32, #tpu.memory_space<vmem>>, vector<8x256xf32>
    %cst_21 = arith.constant 0.000000e+00 : f32
    %40 = vector.broadcast %cst_21 : f32 to vector<8x256xf32>
    %41 = arith.select %27, %39, %40 : vector<8x256xi1>, vector<8x256xf32>
    %c0_22 = arith.constant 0 : index
    %c143 = arith.constant 143 : index
    %42 = vector.load %arg4[%c0_22, %c143] : memref<8x512xf32, #tpu.memory_space<vmem>>, vector<8x256xf32>
    %cst_23 = arith.constant 0.000000e+00 : f32
    %43 = vector.broadcast %cst_23 : f32 to vector<8x256xf32>
    %44 = arith.select %25, %42, %43 : vector<8x256xi1>, vector<8x256xf32>
    %c0_24 = arith.constant 0 : index
    %c144 = arith.constant 144 : index
    %45 = vector.load %arg4[%c0_24, %c144] : memref<8x512xf32, #tpu.memory_space<vmem>>, vector<8x256xf32>
    %c0_25 = arith.constant 0 : index
    %c145 = arith.constant 145 : index
    %46 = vector.load %arg4[%c0_25, %c145] : memref<8x512xf32, #tpu.memory_space<vmem>>, vector<8x256xf32>
    %cst_26 = arith.constant 0.000000e+00 : f32
    %47 = vector.broadcast %cst_26 : f32 to vector<8x256xf32>
    %48 = arith.select %27, %46, %47 : vector<8x256xi1>, vector<8x256xf32>
    %cst_27 = arith.constant 1.000000e+00 : f32
    %49 = vector.broadcast %cst_27 : f32 to vector<1x256xf32>
    %50 = tpu.concatenate %30, %31, %34, %37, %38, %41, %44, %45, %48, %49 in 0 : vector<8x256xf32>, vector<8x256xf32>, vector<8x256xf32>, vector<8x256xf32>, vector<8x256xf32>, vector<8x256xf32>, vector<8x256xf32>, vector<8x256xf32>, vector<8x256xf32>, vector<1x256xf32> -> vector<73x256xf32>
    %c0_28 = arith.constant 0 : index
    %c0_29 = arith.constant 0 : index
    %51 = vector.load %arg2[%c0_28, %c0_29] : memref<8x73xf32, #tpu.memory_space<vmem>>, vector<8x73xf32>
    %cst_30 = arith.constant dense<0.000000e+00> : vector<8x256xf32>
    %52 = tpu.matmul %51, %50, %cst_30 {dimension_numbers = #tpu.dot_dimension_numbers<[1], [0], [0], [1], [0, 0, 1, 1], [], []>} : vector<8x73xf32>, vector<73x256xf32>, vector<8x256xf32> -> vector<8x256xf32>
    %cst_31 = arith.constant 0.000000e+00 : f32
    %53 = vector.broadcast %cst_31 : f32 to vector<8x256xf32>
    %54 = arith.maximumf %52, %53 : vector<8x256xf32>
    %55 = arith.addf %1, %54 : vector<8x256xf32>
    %c0_32 = arith.constant 0 : index
    %c0_33 = arith.constant 0 : index
    %c0_34 = arith.constant 0 : index
    %56 = vector.load %arg3[%c0_32, %c0_33, %c0_34] : memref<1x8x256xf32, #tpu.memory_space<vmem>>, vector<1x8x256xf32>
    %57 = vector.shape_cast %56 : vector<1x8x256xf32> to vector<8x256xf32>
    %58 = vector.shape_cast %55 : vector<8x256xf32> to vector<1x8x256xf32>
    tpu.vector_store %arg3[%c0_32, %c0_33, %c0_34], %58 {strides = array<i32>} : memref<1x8x256xf32, #tpu.memory_space<vmem>>, vector<1x8x256xf32>,
    return
  }
  func.func @transform_0(%arg0: i32) -> (i32, i32, i32) {
    %c0_i32 = arith.constant 0 : i32
    %c0_i32_0 = arith.constant 0 : i32
    %c0_i32_1 = arith.constant 0 : i32
    return %arg0, %c0_i32, %c0_i32_0 : i32, i32, i32
  }
  func.func @transform_1(%arg0: i32) -> (i32, i32) {
    %c0_i32 = arith.constant 0 : i32
    %c0_i32_0 = arith.constant 0 : i32
    %c0_i32_1 = arith.constant 0 : i32
    return %c0_i32, %c0_i32_0 : i32, i32
  }
  func.func @transform_2(%arg0: i32) -> (i32, i32, i32) {
    %c0_i32 = arith.constant 0 : i32
    %c0_i32_0 = arith.constant 0 : i32
    %c0_i32_1 = arith.constant 0 : i32
    return %arg0, %c0_i32, %c0_i32_0 : i32, i32, i32
  }
}

</mosaic_0001>

<bundles_post_ra>
// kernel: tpu_custom_call.1
= control target key start
LH: loop header
LB: loop body
LE: loop exit
PB: predicated region body
PF: predicated region fallthrough
CT: control target
= control target key end

     0   :  { %7 = vsyncpa [#allocation4], 0  ;;  %s484_s0 = inlined_call_operand.hbm [shape: f32[1,8,256], index: 0, kind: input, shape index: {}]   ;;  %s485_s1 = inlined_call_operand.hbm [shape: f32[8,73], index: 1, kind: input, shape index: {}]   ;;  %s486_s2 = inlined_call_operand.hbm [shape: f32[1,8,256], index: 2, kind: output, shape index: {}]  }
   0x1   :  { %8 = vsyncpa [#allocation7], 0 }
   0x2   :  { %9 = vsyncpa [#allocation5], 0  ;;  %s15_s11 = sshll.u32 %s484_s0, 4  ;;  %s379_s12 = smov [#allocation3]   ;;  %s16_s11 = int_to_ptr.hbm [resolvable:$true] %s15_s11 }
   0x3   :  { %s17_s13 = sshll.u32 %s379_s12, 4  ;;  %s26_s16 = sshll.u32 %s485_s1, 4  ;;  %s18_s13 = int_to_ptr.vmem [resolvable:$true] %s17_s13  ;;  %s27_s16 = int_to_ptr.hbm [resolvable:$true] %s26_s16 }
   0x4   :  { %20 = dma.hbm_to_vmem [thread:$0]  %s16_s11, 256, %s18_s13, [#allocation4]  }
   0x5   :  { %s380_s17 = smov [#allocation6]  }
   0x6   :  { %s28_s18 = sshll.u32 %s380_s17, 4  ;;  %s29_s18 = int_to_ptr.vmem [resolvable:$true] %s28_s18 }
   0x7   :  { %31 = dma.hbm_to_vmem [thread:$0]  %s27_s16, 128, %s29_s18, [#allocation7]  }
   0x8   :  { %373 = dma.done.wait [#allocation4], 256  }
   0x9   :  { %374 = vsyncadd [#allocation4], 4294967040 }
   0xa   :  { %375 = dma.done.wait [#allocation7], 128  }
   0xb   :  { %376 = vsyncadd [#allocation7], 4294967168  ;;  %v381_v0 = vmov 0.0   ;;  %s382_s0 = smov 111   ;;  %s383_s19 = smov 112   ;;  %v413_v1 = vld [vmem:[#allocation3] sm:$0xff]  ;;  %v46_v7 = vlaneseq }
   0xc   :  { %158 = vrot.lane.b32.xlu1 %v381_v0, %s382_s0  ;;  %182 = vrot.lane.b32.xlu2 %v381_v0, %s383_s19  ;;  %v415_v2 = vld [vmem:[#allocation3 + $0x8] sm:$0xff]  ;;  %s384_s1 = smov 113   ;;  %s385_s20 = smov 127   ;;  %v296_v4 = vpack.i.bf16 %v413_v1, %v381_v0  ;;  %vm194_vm0 = vcmask 1040384   ;;  %v390_v5 = vmov 1.0   ;;  %vm160_vm1 = vcmask 908288  }
   0xd   :  { %154 = vrot.lane.b32.xlu0 %v413_v1, %s382_s0  ;;  %v291_v3 = vpack.i.bf16 %v415_v2, %v413_v1  ;;  %s386_s21 = smov 1   ;;  %s387_s22 = smov 15   ;;  %262 = vmatpush.msk.msra.mxu0 %vm194_vm0, %v390_v5  ;;  %v47_v10 = vand.u32 127, %v46_v7  ;;  %vm184_vm4 = vcmask 916480   ;;  %vm147_vm5 = vcmask 924672   ;;  %v189_v53 = vld [vmem:[#allocation6] sm:$0xff] }
   0xe   :  { %s388_s23 = smov 16   ;;  %s389_s24 = smov 17   ;;  %270 = vmatpush.msk.msra.mxu1 %vm194_vm0, %v390_v5  ;;  %vm134_vm8 = vcmask 1039360   ;;  %vm115_vm9 = vcmask 7168   ;;  %vm102_vm10 = vcmask 121856   ;;  %vm173_vm11 = vcmask 130048  }
   0xf   :  { %v48_v11 = vadd.s32 128, %v47_v10  ;;  %v53_v15 = vand.u32 15, %v47_v10  ;;  %vm89_vm12 = vcmask 138240   ;;  %vm190_vm13 = vcmask 596992   ;;  %s391_s25 = smov [#allocation8]   ;;  %s251_s29 = sshll.u32 %s486_s2, 4  ;;  %s252_s29 = int_to_ptr.hbm [resolvable:$true] %s251_s29 }
  0x10   :  { %s249_s26 = sshll.u32 %s391_s25, 4  ;;  %s250_s26 = int_to_ptr.vmem [resolvable:$true] %s249_s26 }
  0x11   :  { %v60_v16 = vand.u32 15, %v48_v11  ;;  %vm433_vm2 = vcmp.le.s32.totalorder %v53_v15, 14  ;;  %vm445_vm6 = vcmp.ge.s32.totalorder %v53_v15, 1 }
  0x13   :  { %vm437_vm3 = vcmp.le.s32.totalorder %v60_v16, 14  ;;  %vm449_vm7 = vcmp.ge.s32.totalorder %v60_v16, 1 }
  0x14   :  { %141 = vrot.lane.b32.xlu2 %v413_v1, %s384_s1  ;;  %292 = vrot.lane.b32.xlu1 %v291_v3, %s383_s19 }
  0x15   :  { %156 = vrot.lane.b32.xlu0 %v415_v2, %s382_s0 }
  0x1c   :  { %128 = vrot.lane.b32.xlu2 %v413_v1, %s385_s20  ;;  %145 = vrot.lane.b32.xlu1 %v381_v0, %s384_s1 }
  0x1d   :  { %143 = vrot.lane.b32.xlu0 %v415_v2, %s384_s1 }
  0x24   :  { %109 = vrot.lane.b32.xlu2 %v381_v0, %s386_s21  ;;  %132 = vrot.lane.b32.xlu1 %v381_v0, %s385_s20 }
  0x25   :  { %130 = vrot.lane.b32.xlu0 %v415_v2, %s385_s20 }
  0x2c   :  { %96 = vrot.lane.b32.xlu2 %v381_v0, %s387_s22  ;;  %113 = vrot.lane.b32.xlu1 %v415_v2, %s386_s21 }
  0x2d   :  { %111 = vrot.lane.b32.xlu0 %v413_v1, %s386_s21 }
  0x34   :  { %297 = vrot.lane.b32.xlu2 %v296_v4, %s388_s23  ;;  %100 = vrot.lane.b32.xlu1 %v415_v2, %s387_s22 }
  0x35   :  { %98 = vrot.lane.b32.xlu0 %v413_v1, %s387_s22 }
  0x3c   :  { %85 = vrot.lane.b32.xlu2 %v413_v1, %s389_s24  ;;  %83 = vrot.lane.b32.xlu1 %v381_v0, %s389_s24 }
  0x3d   :  { %171 = vrot.lane.b32.xlu0 %v415_v2, %s388_s23 }
  0x45   :  { %87 = vrot.lane.b32.xlu0 %v415_v2, %s389_s24 }
  0x66   :  { %v183_v6 = vpop.permute.xlu2 %182 }
  0x6e   :  { %v142_v8 = vpop.permute.xlu2 %141 }
  0x76   :  { %v129_v14 = vpop.permute.xlu2 %128 }
  0x7e   :  { %v159_v9 = vpop.permute.xlu1 %158  ;;  %v110_v27 = vpop.permute.xlu2 %109 }
  0x7f   :  { %v155_v12 = vpop.permute.xlu0 %154 }
  0x86   :  { %v293_v13 = vpop.permute.xlu1 %292  ;;  %v97_v34 = vpop.permute.xlu2 %96 }
  0x87   :  { %v294_v17 = vunpack.i.l.bf16 %v293_v13  ;;  %v295_v18 = vunpack.i.h.bf16 %v293_v13  ;;  %v157_v21 = vpop.permute.xlu0 %156 }
  0x88   :  { %v161_v22 = vsel %vm160_vm1, %v155_v12, %v157_v21  ;;  %v162_v23 = vsel %vm160_vm1, %v157_v21, %v159_v9 }
  0x89   :  { %v185_v24 = vsel %vm184_vm4, %v294_v17, %v295_v18  ;;  %263 = vmatpush.msk.msra.mxu0 %vm433_vm2, %v161_v22  ;;  %271 = vmatpush.msk.msra.mxu1 %vm437_vm3, %v162_v23  ;;  %v186_v26 = vsel %vm184_vm4, %v295_v18, %v183_v6 }
  0x8b   :  { %226 = vmatpush.msra.mxu1 %v186_v26  ;;  %206 = vmatpush.msra.mxu0 %v185_v24 }
  0x8e   :  { %v146_v25 = vpop.permute.xlu1 %145  ;;  %v298_v40 = vpop.permute.xlu2 %297 }
  0x8f   :  { %v144_v30 = vpop.permute.xlu0 %143  ;;  %v299_v44 = vunpack.i.l.bf16 %v298_v40  ;;  %v300_v45 = vunpack.i.h.bf16 %v298_v40 }
  0x90   :  { %v148_v31 = vsel %vm147_vm5, %v142_v8, %v144_v30  ;;  %v149_v32 = vsel %vm147_vm5, %v144_v30, %v146_v25 }
  0x91   :  { %264 = vmatpush.msk.msra.mxu0 %vm445_vm6, %v148_v31  ;;  %272 = vmatpush.msk.msra.mxu1 %vm449_vm7, %v149_v32  ;;  %v174_v50 = vsel %vm173_vm11, %v299_v44, %v300_v45 }
  0x96   :  { %v133_v33 = vpop.permute.xlu1 %132  ;;  %v86_v47 = vpop.permute.xlu2 %85 }
  0x97   :  { %v131_v35 = vpop.permute.xlu0 %130 }
  0x98   :  { %v135_v36 = vsel %vm134_vm8, %v129_v14, %v131_v35  ;;  %v136_v37 = vsel %vm134_vm8, %v131_v35, %v133_v33 }
  0x99   :  { %265 = vmatpush.msk.msra.mxu0 %vm433_vm2, %v135_v36  ;;  %273 = vmatpush.msk.msra.mxu1 %vm437_vm3, %v136_v37 }
  0x9b   :  { %209 = vmatpush.msra.mxu0 %v413_v1  ;;  %229 = vmatpush.msra.mxu1 %v415_v2 }
  0x9e   :  { %v114_v38 = vpop.permute.xlu1 %113 }
  0x9f   :  { %v112_v39 = vpop.permute.xlu0 %111 }
  0xa0   :  { %v116_v41 = vsel %vm115_vm9, %v110_v27, %v112_v39  ;;  %v117_v42 = vsel %vm115_vm9, %v112_v39, %v114_v38 }
  0xa1   :  { %266 = vmatpush.msk.msra.mxu0 %vm445_vm6, %v116_v41  ;;  %274 = vmatpush.msk.msra.mxu1 %vm449_vm7, %v117_v42 }
  0xa6   :  { %v101_v43 = vpop.permute.xlu1 %100 }
  0xa7   :  { %v99_v46 = vpop.permute.xlu0 %98 }
  0xa8   :  { %v103_v48 = vsel %vm102_vm10, %v97_v34, %v99_v46  ;;  %v104_v49 = vsel %vm102_vm10, %v99_v46, %v101_v43 }
  0xa9   :  { %267 = vmatpush.msk.msra.mxu0 %vm433_vm2, %v103_v48  ;;  %275 = vmatpush.msk.msra.mxu1 %vm437_vm3, %v104_v49 }
  0xab   :  { %212 = vmatpush.msra.mxu0 %v174_v50 }
  0xae   :  { %v84_v51 = vpop.permute.xlu1 %83 }
  0xaf   :  { %v90_v52 = vsel %vm89_vm12, %v84_v51, %v86_v47  ;;  %v172_v54 = vpop.permute.xlu0 %171 }
  0xb0   :  { %268 = vmatpush.msk.msra.mxu0 %vm445_vm6, %v90_v52  ;;  %v175_v55 = vsel %vm173_vm11, %v300_v45, %v172_v54 }
  0xb1   :  { %269 = vmatmul.msk.f32.vlgmr.msra.gmra.mxu0 %vm190_vm13, %v189_v53  ;;  %232 = vmatpush.msra.mxu1 %v175_v55 }
  0xb7   :  { %v88_v56 = vpop.permute.xlu0 %87 }
  0xb8   :  { %v91_v57 = vsel %vm89_vm12, %v86_v47, %v88_v56 }
  0xb9   :  { %276 = vmatpush.msk.msra.mxu1 %vm449_vm7, %v91_v57 }
  0xba   :  { %277 = vmatmul.msk.f32.vlgmr.msra.gmra.mxu1 %vm190_vm13, %v189_v53 }
 0x12e   :  { %v215_v58 = vpop.f32.mrf.mxu0 }
 0x12f   :  { %v238_v59 = vmax.f32 %v215_v58, 0.0 }
 0x131   :  { %v240_v60 = vadd.f32 %v238_v59, %v413_v1 }
 0x133   :  { %242 = vst [vmem:[#allocation8] sm:$0xff] %v240_v60 }
 0x137   :  { %v235_v61 = vpop.f32.mrf.mxu1 }
 0x138   :  { %v239_v62 = vmax.f32 %v235_v61, 0.0 }
 0x13a   :  { %v241_v63 = vadd.f32 %v239_v62, %v415_v2 }
 0x13c   :  { %243 = vst [vmem:[#allocation8 + $0x8] sm:$0xff] %v241_v63 }
 0x13d   :  { %254 = dma.vmem_to_hbm [thread:$0]  %s250_s26, 256, %s252_s29, [#allocation5]  }
 0x13e   :  { %377 = dma.done.wait [#allocation5], 256  }
 0x13f   :  { %378 = vsyncadd [#allocation5], 4294967040 }
 0x140   :  { %259 = vsyncpa [#allocation4], 1 }
 0x141   :  { %260 = vsyncpa [#allocation7], 1 }
 0x142   :  { %261 = vsyncpa [#allocation5], 1 }

</bundles_post_ra>
